<compile_context>
chip_gen: v6e
topology: v6e:2x2x1
jax: 0.10.0
libtpu: 0.0.40
codegen_flags: <defaults>
</compile_context>

<pallas_src>
import math

import jax
import jax.numpy as jnp
from jax import lax
from jax.experimental import pallas as pl
from jax.experimental.pallas import tpu as pltpu


MATMUL_DTYPE = jnp.bfloat16          # MXU input dtype (f32 accumulation kept)
NEG_INF = -1e30                      # large-negative finite mask bias (no NaN rows)
LN_EPS = 1e-5                        # PyTorch LayerNorm default


def _default_vmem_limit():
    # Half of physical VMEM, capped: v5e/v6e (128 MiB) -> 64 MiB, v7x (64 MiB) -> 32 MiB.
    try:
        info = pltpu.get_tpu_info()
        cap = int(getattr(info, "vmem_capacity_bytes", 128 * 1024 * 1024))
        return int(min(cap // 2, 96 * 1024 * 1024))
    except Exception:
        return 32 * 1024 * 1024


VMEM_LIMIT = _default_vmem_limit()


# ----------------------------------------------------------------------------
# In-kernel helpers
# ----------------------------------------------------------------------------

def _bf16(x):
    return x if x.dtype == MATMUL_DTYPE else x.astype(MATMUL_DTYPE)


def _mm(a, b):
    """a @ b on the MXU: bf16 inputs (weights already bf16), f32 accumulation."""
    return jnp.dot(_bf16(a), _bf16(b), preferred_element_type=jnp.float32)


def _mm_nt(a, b):
    """a @ b.T without materializing the transpose (MXU handles it natively)."""
    return lax.dot_general(_bf16(a), _bf16(b), (((1,), (1,)), ((), ())),
                           preferred_element_type=jnp.float32)


def _gelu_exact(y):
    # exact (erf) GELU, matching PyTorch activation='gelu'
    return 0.5 * y * (1.0 + lax.erf(y * (1.0 / math.sqrt(2.0))))


def _layernorm(x, g, b):
    mu = jnp.mean(x, axis=-1, keepdims=True)
    xc = x - mu
    var = jnp.mean(xc * xc, axis=-1, keepdims=True)
    return xc * lax.rsqrt(var + LN_EPS) * g + b


def _mha(xq, xkv, wqkv_ref, bqkv_ref, wo_ref, bo, bias, num_heads):
    """Multi-head attention, head-major weights (all head access = leading-dim index).

    xq: (Sq, D), xkv: (Sk, D)
    wqkv_ref: (3H, D, hd) ref  -- q weights at [0:H], k at [H:2H], v at [2H:3H]
    bqkv_ref: (3H, 1, hd) ref, wo_ref: (H, hd, D) ref, bo: (1, D)
    bias: additive (Sq, Sk) score bias or None.
    """
    hd = wqkv_ref.shape[-1]
    scale = 1.0 / math.sqrt(hd)
    out = None
    # TODO(synk): for large S / num_heads, switch to lax.fori_loop(unroll=True)
    # with a carried accumulator to bound live ranges; at these sizes a static
    # unrolled loop with leading-dim indexed weights is cheapest & most robust.
    for h in range(num_heads):
        q = _mm(xq, wqkv_ref[h]) + bqkv_ref[h]                       # (Sq, hd)
        k = _mm(xkv, wqkv_ref[num_heads + h]) + bqkv_ref[num_heads + h]
        v = _mm(xkv, wqkv_ref[2 * num_heads + h]) + bqkv_ref[2 * num_heads + h]
        s = _mm_nt(q, k) * scale                                     # (Sq, Sk)
        if bias is not None:
            s = s + bias
        m = jnp.max(s, axis=-1, keepdims=True)
        p = jnp.exp(s - m)                                           # unnormalized
        inv_l = pl.reciprocal(jnp.sum(p, axis=-1, keepdims=True), approx=True)
        oh = _mm(p, v) * inv_l                                       # (Sq, hd)
        contrib = _mm(oh, wo_ref[h])                                 # fused out-proj
        out = contrib if out is None else out + contrib
    return out + bo


# ----------------------------------------------------------------------------
# Kernels
# ----------------------------------------------------------------------------

def _make_stack_kernel(num_heads, use_pad_bias):
    """Whole TransformerDecoder stack; grid = (batch, layer), x resident in VMEM."""
    def kernel(*refs):
        if use_pad_bias:
            (x_ref, mem_ref, pad_ref,
             sa_wqkv, sa_bqkv, sa_wo, sa_bo,
             ca_wqkv, ca_bqkv, ca_wo, ca_bo,
             ff1_w, ff1_b, ff2_w, ff2_b,
             ln1_g, ln1_b, ln2_g, ln2_b, ln3_g, ln3_b,
             o_ref) = refs
        else:
            (x_ref, mem_ref,
             sa_wqkv, sa_bqkv, sa_wo, sa_bo,
             ca_wqkv, ca_bqkv, ca_wo, ca_bo,
             ff1_w, ff1_b, ff2_w, ff2_b,
             ln1_g, ln1_b, ln2_g, ln2_b, ln3_g, ln3_b,
             o_ref) = refs
            pad_ref = None

        layer = pl.program_id(1)                 # "arbitrary" (sequential) axis

        # Load embedded tokens once per batch element; afterwards the activation
        # lives in the revisited VMEM output block across all layers.
        @pl.when(layer == 0)
        def _():
            o_ref[...] = x_ref[...]

        x = o_ref[...]                           # (S, D) f32
        mem = mem_ref[...]                       # (M, D) f32
        S = x.shape[0]

        # causal (+ optional key-padding) additive bias, built in-kernel (no HBM),
        # hoisted out of the head loop.
        row = lax.broadcasted_iota(jnp.int32, (S, S), 0)
        col = lax.broadcasted_iota(jnp.int32, (S, S), 1)
        self_bias = jnp.where(col > row, NEG_INF, 0.0).astype(jnp.float32)
        if pad_ref is not None:
            self_bias = self_bias + pad_ref[...]          # (1, S) broadcasts over rows

        # ---- self-attention + residual + LN1 (post-norm TransformerDecoderLayer) ----
        sa = _mha(x, x, sa_wqkv, sa_bqkv, sa_wo, sa_bo[...], self_bias, num_heads)
        x = _layernorm(x + sa, ln1_g[...], ln1_b[...])

        # ---- cross-attention (no mask) + residual + LN2 ----
        ca = _mha(x, mem, ca_wqkv, ca_bqkv, ca_wo, ca_bo[...], None, num_heads)
        x = _layernorm(x + ca, ln2_g[...], ln2_b[...])

        # ---- feed-forward (exact GELU) + residual + LN3 ----
        h = _gelu_exact(_mm(x, ff1_w[...]) + ff1_b[...])
        h = _mm(h, ff2_w[...]) + ff2_b[...]
        x = _layernorm(x + h, ln3_g[...], ln3_b[...])

        o_ref[...] = x
    return kernel


def _encoder_kernel(pix_ref, enc_w, enc_b, proj_w, proj_b, o_ref):
    # synthetic encoder (1x1 conv == per-pixel linear) fused with encoder_proj
    h = _mm(pix_ref[...], enc_w[...]) + enc_b[...]
    o_ref[...] = _mm(h, proj_w[...]) + proj_b[...]


def _linear_kernel(x_ref, w_ref, b_ref, o_ref):
    o_ref[...] = _mm(x_ref[...], w_ref[...]) + b_ref[...]


# ----------------------------------------------------------------------------
# Pallas wrappers
# ----------------------------------------------------------------------------

def _fit_tile(dim, target, align):
    """Largest tile <= target that divides dim and is a multiple of `align`;
    falls back to the full dim (always a legal BlockSpec block)."""
    if dim <= target:
        return dim
    t = (target // align) * align
    while t >= align:
        if dim % t == 0:
            return t
        t -= align
    return dim


def _full_spec(shape):
    nd = len(shape)
    return pl.BlockSpec(shape, lambda *idx, _n=nd: (0,) * _n)


def encode(pix, enc_w, enc_b, proj_w, proj_b, *, tm=1024):
    """pix: (rows, C) -> (rows, D); encoder + encoder_proj fused, row-tiled."""
    rows, C = pix.shape
    E = enc_w.shape[1]
    D = proj_w.shape[1]
    tm = _fit_tile(rows, tm, 8)
    return pl.pallas_call(
        _encoder_kernel,
        grid=(rows // tm,),
        in_specs=[pl.BlockSpec((tm, C), lambda i: (i, 0)),
                  _full_spec((C, E)), _full_spec((1, E)),
                  _full_spec((E, D)), _full_spec((1, D))],
        out_specs=pl.BlockSpec((tm, D), lambda i: (i, 0)),
        out_shape=jax.ShapeDtypeStruct((rows, D), jnp.float32),
        compiler_params=pltpu.CompilerParams(
            dimension_semantics=("parallel",),
            vmem_limit_bytes=VMEM_LIMIT),
    )(pix, enc_w, enc_b, proj_w, proj_b)


def linear(x2d, w, b, *, tm=512, tn=1024):
    """Tiled x @ w + b.  Grid over M rows and N (lane-dense, >=128) output columns."""
    M, K = x2d.shape
    N = w.shape[1]
    tm = _fit_tile(M, tm, 8)
    tn = _fit_tile(N, tn, 128)
    # TODO(synk): K is small (<=4*embed_dim) in this model; no K-reduction grid axis.
    return pl.pallas_call(
        _linear_kernel,
        grid=(M // tm, N // tn),
        in_specs=[pl.BlockSpec((tm, K), lambda i, j: (i, 0)),
                  pl.BlockSpec((K, tn), lambda i, j: (0, j)),
                  pl.BlockSpec((1, tn), lambda i, j: (0, j))],
        out_specs=pl.BlockSpec((tm, tn), lambda i, j: (i, j)),
        out_shape=jax.ShapeDtypeStruct((M, N), jnp.float32),
        compiler_params=pltpu.CompilerParams(
            dimension_semantics=("parallel", "parallel"),
            vmem_limit_bytes=VMEM_LIMIT),
    )(x2d, w, b)


def decoder_stack(x, mem, layers, num_heads, pad_bias=None):
    """All TransformerDecoder layers in ONE pallas_call; grid = (batch, layer)."""
    B, S, D = x.shape
    M = mem.shape[1]
    L = layers["sa_wqkv"].shape[0]

    def act_spec(s1, s2):
        return pl.BlockSpec((None, s1, s2), lambda b, l: (b, 0, 0))

    def w_spec(arr):
        nd = arr.ndim
        return pl.BlockSpec((None,) + arr.shape[1:],
                            lambda b, l, _n=nd: (l,) + (0,) * (_n - 1))

    weight_names = ["sa_wqkv", "sa_bqkv", "sa_wo", "sa_bo",
                    "ca_wqkv", "ca_bqkv", "ca_wo", "ca_bo",
                    "ff1_w", "ff1_b", "ff2_w", "ff2_b",
                    "ln1_g", "ln1_b", "ln2_g", "ln2_b", "ln3_g", "ln3_b"]
    weights = [layers[n] for n in weight_names]

    inputs = [x, mem]
    in_specs = [act_spec(S, D), act_spec(M, D)]
    if pad_bias is not None:
        inputs.append(pad_bias)                 # (B, 1, S) additive key-padding bias
        in_specs.append(act_spec(1, S))
    inputs += weights
    in_specs += [w_spec(w) for w in weights]

    return pl.pallas_call(
        _make_stack_kernel(num_heads, pad_bias is not None),
        grid=(B, L),
        in_specs=in_specs,
        out_specs=act_spec(S, D),               # same block across layer axis -> resident
        out_shape=jax.ShapeDtypeStruct((B, S, D), jnp.float32),
        compiler_params=pltpu.CompilerParams(
            dimension_semantics=("parallel", "arbitrary"),
            vmem_limit_bytes=VMEM_LIMIT),
    )(*inputs)


# ----------------------------------------------------------------------------
# Model (parameters + forward)
# ----------------------------------------------------------------------------

def sinusoidal_positional_encoding(max_len, d_model):
    position = jnp.arange(max_len, dtype=jnp.float32)[:, None]
    div_term = jnp.exp(jnp.arange(0, d_model, 2, dtype=jnp.float32)
                       * (-math.log(10000.0) / d_model))
    pe = jnp.zeros((max_len, d_model), jnp.float32)
    pe = pe.at[:, 0::2].set(jnp.sin(position * div_term))
    pe = pe.at[:, 1::2].set(jnp.cos(position * div_term))
    return pe


def init_params(key, *, in_channels, encoder_dim, embed_dim, vocab_size,
                max_seq_len, num_layers, num_heads):
    D, F, H = embed_dim, 4 * embed_dim, num_heads
    hd = D // H
    L = num_layers
    Vp = ((vocab_size + 127) // 128) * 128      # lane-dense padded vocab
    W = MATMUL_DTYPE

    def nrm(k, shape, std=0.02, dtype=jnp.float32):
        return (std * jax.random.normal(k, shape, jnp.float32)).astype(dtype)

    ks = iter(jax.random.split(key, 16))

    out_w = nrm(next(ks), (D, vocab_size), math.sqrt(2.0 / (D + vocab_size)))
    out_w = jnp.pad(out_w, ((0, 0), (0, Vp - vocab_size))).astype(W)

    params = {
        # synthetic encoder: 1x1 conv (per-pixel linear), bf16 weight
        "enc_w": nrm(next(ks), (in_channels, encoder_dim), 0.1, W),
        "enc_b": jnp.zeros((1, encoder_dim), jnp.float32),
        # encoder_proj: Linear(encoder_dim, embed_dim)
        "proj_w": nrm(next(ks), (encoder_dim, D), 0.1, W),
        "proj_b": jnp.zeros((1, D), jnp.float32),
        # token embedding (std=0.02 like _init_weights); gather stays f32
        "tok_emb": nrm(next(ks), (vocab_size, D), 0.02),
        # sinusoidal position encoding buffer
        "pos_enc": sinusoidal_positional_encoding(max_seq_len, D),
        # output layer (xavier-ish scale, zero bias), padded to Vp lanes
        "out_w": out_w,
        "out_b": jnp.zeros((1, Vp), jnp.float32),
        # per-layer weights stacked along a leading L axis, head-major layouts
        "layers": {
            "sa_wqkv": nrm(next(ks), (L, 3 * H, D, hd), 0.1, W),
            "sa_bqkv": jnp.zeros((L, 3 * H, 1, hd), jnp.float32),
            "sa_wo":   nrm(next(ks), (L, H, hd, D), 0.1, W),
            "sa_bo":   jnp.zeros((L, 1, D), jnp.float32),
            "ca_wqkv": nrm(next(ks), (L, 3 * H, D, hd), 0.1, W),
            "ca_bqkv": jnp.zeros((L, 3 * H, 1, hd), jnp.float32),
            "ca_wo":   nrm(next(ks), (L, H, hd, D), 0.1, W),
            "ca_bo":   jnp.zeros((L, 1, D), jnp.float32),
            "ff1_w":   nrm(next(ks), (L, D, F), 0.1, W),
            "ff1_b":   jnp.zeros((L, 1, F), jnp.float32),
            "ff2_w":   nrm(next(ks), (L, F, D), 0.1, W),
            "ff2_b":   jnp.zeros((L, 1, D), jnp.float32),
            "ln1_g":   jnp.ones((L, 1, D), jnp.float32),
            "ln1_b":   jnp.zeros((L, 1, D), jnp.float32),
            "ln2_g":   jnp.ones((L, 1, D), jnp.float32),
            "ln2_b":   jnp.zeros((L, 1, D), jnp.float32),
            "ln3_g":   jnp.ones((L, 1, D), jnp.float32),
            "ln3_b":   jnp.zeros((L, 1, D), jnp.float32),
        },
    }
    return params


def forward(params, img, caption_tokens, *, num_heads, pad_mask=None):
    B, C, Hh, Ww = img.shape
    vocab, D = params["tok_emb"].shape

    # ---- encoder (1x1 conv) + encoder_proj, fused into one kernel ----
    pix = jnp.transpose(img, (0, 2, 3, 1)).reshape(B * Hh * Ww, C)      # NCHW -> rows
    mem = encode(pix, params["enc_w"], params["enc_b"],
                 params["proj_w"], params["proj_b"])                    # (B*H*W, D)
    mem = mem.reshape(B, Hh * Ww, D)

    # ---- token embedding + sinusoidal PE (gather is wrapper glue) ----
    S = caption_tokens.shape[1]
    tok = params["tok_emb"][caption_tokens]                             # (B, S, D)
    x = tok * math.sqrt(D) + params["pos_enc"][:S][None, :, :]

    # optional key-padding bias (tiny (B,1,S)); causal mask is built in-kernel
    pad_bias = None
    if pad_mask is not None:
        pad_bias = jnp.where(pad_mask, NEG_INF, 0.0).astype(jnp.float32)
        pad_bias = pad_bias.reshape(B, 1, S)

    # ---- TransformerDecoder: ALL layers fused in one pallas_call ----
    x = decoder_stack(x, mem, params["layers"], num_heads, pad_bias)

    # ---- output projection to (lane-dense padded) vocab, slice back ----
    logits = linear(x.reshape(B * S, D), params["out_w"], params["out_b"])
    return logits[:, :vocab].reshape(B, S, vocab)


# ----------------------------------------------------------------------------
# Main
# ----------------------------------------------------------------------------

if __name__ == "__main__":
    B, C, H, W = 2, 4, 8, 8
    vocab_size, max_seq_len = 64, 16
    encoder_dim, embed_dim = 16, 32
    num_heads, num_layers = 8, 2
    seq_len = 8

    key = jax.random.PRNGKey(0)
    k_img, k_tok, k_param = jax.random.split(key, 3)

    img = jax.random.normal(k_img, (B, C, H, W), jnp.float32)
    caption_tokens = jax.random.randint(k_tok, (B, seq_len), 0, vocab_size)

    params = init_params(k_param, in_channels=C, encoder_dim=encoder_dim,
                         embed_dim=embed_dim, vocab_size=vocab_size,
                         max_seq_len=max_seq_len, num_layers=num_layers,
                         num_heads=num_heads)

    logits = forward(params, img, caption_tokens,
                     num_heads=num_heads, pad_mask=None)
    logits = jax.block_until_ready(logits)

    assert logits.shape == (B, seq_len, vocab_size), logits.shape
    assert bool(jnp.all(jnp.isfinite(logits)))
    print("KERNEL_OK")
</pallas_src>

<mosaic_0001>
module attributes {stable_mosaic.version = 11 : i64} {
  func.func @_encoder_kernel(%arg0: i32, %arg1: memref<128x4xf32, #tpu.memory_space<vmem>>, %arg2: memref<4x16xbf16, #tpu.memory_space<vmem>>, %arg3: memref<1x16xf32, #tpu.memory_space<vmem>>, %arg4: memref<16x32xbf16, #tpu.memory_space<vmem>>, %arg5: memref<1x32xf32, #tpu.memory_space<vmem>>, %arg6: memref<128x32xf32, #tpu.memory_space<vmem>>) attributes {dimension_semantics = [#tpu.dimension_semantics<parallel>], iteration_bounds = array<i64: 1>, scalar_prefetch = 0 : i64, scratch_operands = 0 : i64, tpu.core_type = #tpu.core_type<tc>, window_params = [{transform_indices = @transform_0, window_bounds = array<i64: 128, 4>}, {pipeline_mode = #tpu.pipeline_mode<synchronous>, transform_indices = @transform_1, window_bounds = array<i64: 4, 16>}, {pipeline_mode = #tpu.pipeline_mode<synchronous>, transform_indices = @transform_2, window_bounds = array<i64: 1, 16>}, {pipeline_mode = #tpu.pipeline_mode<synchronous>, transform_indices = @transform_3, window_bounds = array<i64: 16, 32>}, {pipeline_mode = #tpu.pipeline_mode<synchronous>, transform_indices = @transform_4, window_bounds = array<i64: 1, 32>}, {transform_indices = @transform_5, window_bounds = array<i64: 128, 32>}]} {
    %c0 = arith.constant 0 : index
    %c0_0 = arith.constant 0 : index
    %0 = vector.load %arg1[%c0, %c0_0] : memref<128x4xf32, #tpu.memory_space<vmem>>, vector<128x4xf32>
    %c0_1 = arith.constant 0 : index
    %c0_2 = arith.constant 0 : index
    %1 = vector.load %arg2[%c0_1, %c0_2] : memref<4x16xbf16, #tpu.memory_space<vmem>>, vector<4x16xbf16>
    %2 = arith.truncf %0 : vector<128x4xf32> to vector<128x4xbf16>
    %cst = arith.constant dense<0.000000e+00> : vector<128x16xf32>
    %3 = tpu.matmul %2, %1, %cst {dimension_numbers = #tpu.dot_dimension_numbers<[1], [0], [0], [1], [0, 0, 1, 1], [], []>} : vector<128x4xbf16>, vector<4x16xbf16>, vector<128x16xf32> -> vector<128x16xf32>
    %c0_3 = arith.constant 0 : index
    %c0_4 = arith.constant 0 : index
    %4 = vector.load %arg3[%c0_3, %c0_4] : memref<1x16xf32, #tpu.memory_space<vmem>>, vector<1x16xf32>
    %5 = vector.broadcast %4 : vector<1x16xf32> to vector<128x16xf32>
    %6 = arith.addf %3, %5 : vector<128x16xf32>
    %c0_5 = arith.constant 0 : index
    %c0_6 = arith.constant 0 : index
    %7 = vector.load %arg4[%c0_5, %c0_6] : memref<16x32xbf16, #tpu.memory_space<vmem>>, vector<16x32xbf16>
    %8 = arith.truncf %6 : vector<128x16xf32> to vector<128x16xbf16>
    %cst_7 = arith.constant dense<0.000000e+00> : vector<128x32xf32>
    %9 = tpu.matmul %8, %7, %cst_7 {dimension_numbers = #tpu.dot_dimension_numbers<[1], [0], [0], [1], [0, 0, 1, 1], [], []>} : vector<128x16xbf16>, vector<16x32xbf16>, vector<128x32xf32> -> vector<128x32xf32>
    %c0_8 = arith.constant 0 : index
    %c0_9 = arith.constant 0 : index
    %10 = vector.load %arg5[%c0_8, %c0_9] : memref<1x32xf32, #tpu.memory_space<vmem>>, vector<1x32xf32>
    %11 = vector.broadcast %10 : vector<1x32xf32> to vector<128x32xf32>
    %12 = arith.addf %9, %11 : vector<128x32xf32>
    %c0_10 = arith.constant 0 : index
    %c0_11 = arith.constant 0 : index
    %13 = vector.load %arg6[%c0_10, %c0_11] : memref<128x32xf32, #tpu.memory_space<vmem>>, vector<128x32xf32>
    tpu.vector_store %arg6[%c0_10, %c0_11], %12 {strides = array<i32>} : memref<128x32xf32, #tpu.memory_space<vmem>>, vector<128x32xf32>,
    return
  }
  func.func @transform_0(%arg0: i32) -> (i32, i32) {
    %c0_i32 = arith.constant 0 : i32
    %c0_i32_0 = arith.constant 0 : i32
    return %arg0, %c0_i32 : i32, i32
  }
  func.func @transform_1(%arg0: i32) -> (i32, i32) {
    %c0_i32 = arith.constant 0 : i32
    %c0_i32_0 = arith.constant 0 : i32
    %c0_i32_1 = arith.constant 0 : i32
    return %c0_i32, %c0_i32_0 : i32, i32
  }
  func.func @transform_2(%arg0: i32) -> (i32, i32) {
    %c0_i32 = arith.constant 0 : i32
    %c0_i32_0 = arith.constant 0 : i32
    %c0_i32_1 = arith.constant 0 : i32
    return %c0_i32, %c0_i32_0 : i32, i32
  }
  func.func @transform_3(%arg0: i32) -> (i32, i32) {
    %c0_i32 = arith.constant 0 : i32
    %c0_i32_0 = arith.constant 0 : i32
    %c0_i32_1 = arith.constant 0 : i32
    return %c0_i32, %c0_i32_0 : i32, i32
  }
  func.func @transform_4(%arg0: i32) -> (i32, i32) {
    %c0_i32 = arith.constant 0 : i32
    %c0_i32_0 = arith.constant 0 : i32
    %c0_i32_1 = arith.constant 0 : i32
    return %c0_i32, %c0_i32_0 : i32, i32
  }
  func.func @transform_5(%arg0: i32) -> (i32, i32) {
    %c0_i32 = arith.constant 0 : i32
    %c0_i32_0 = arith.constant 0 : i32
    return %arg0, %c0_i32 : i32, i32
  }
}

</mosaic_0001>

<bundles_post_ra>
// kernel: tpu_custom_call.1
= control target key start
LH: loop header
LB: loop body
LE: loop exit
PB: predicated region body
PF: predicated region fallthrough
CT: control target
= control target key end

     0   :  { %vm78_vm0 = vcmask 1041408   ;;  %vm53_vm1 = vcmask 31744   ;;  %vm202_vm2 = vcmask 130048   ;;  %vm324_vm3 = vcmask 261120   ;;  %s590_s1 = inlined_call_operand.vmem [shape: bf16[4,16], index: 1, kind: input, shape index: {}]   ;;  %s591_s0 = inlined_call_operand.vmem [shape: f32[128,4], index: 0, kind: input, shape index: {}]   ;;  %s592_s3 = inlined_call_operand.vmem [shape: bf16[16,32], index: 3, kind: input, shape index: {}]   ;;  %s593_s2 = inlined_call_operand.vmem [shape: f32[1,16], index: 2, kind: input, shape index: {}]   ;;  %s594_s4 = inlined_call_operand.vmem [shape: f32[1,32], index: 4, kind: input, shape index: {}]   ;;  %s595_s5 = inlined_call_operand.vmem [shape: f32[128,32], index: 5, kind: output, shape index: {}]  }
   0x1   :  { %v37_v0 = vld [vmem:[%s590_s1] sm:$0x3]  ;;  %v22_v2 = vld [vmem:[%s591_s0 + $0x8] sm:$0xff]  ;;  %v23_v5 = vld [vmem:[%s591_s0 + $0x10] sm:$0xff] }
   0x2   :  { %v21_v1 = vld [vmem:[%s591_s0] sm:$0xff]  ;;  %418 = vmatprep.subr.msk.bf16.mxu0 %vm78_vm0, %v37_v0  ;;  %v80_v3 = vsel %vm78_vm0, %v37_v0, 0  ;;  %v24_v6 = vld [vmem:[%s591_s0 + $0x18] sm:$0xff]  ;;  %v26_v9 = vld [vmem:[%s591_s0 + $0x28] sm:$0xff] }
   0x3   :  { %v38_v4 = vpack.c.bf16 %v22_v2, %v21_v1  ;;  %v25_v7 = vld [vmem:[%s591_s0 + $0x20] sm:$0xff]  ;;  %383 = vmatpush3.bf16.msra.mxu0 %v80_v3  ;;  %v39_v8 = vpack.c.bf16 %v24_v6, %v23_v5  ;;  %v27_v11 = vld [vmem:[%s591_s0 + $0x30] sm:$0xff]  ;;  %v28_v12 = vld [vmem:[%s591_s0 + $0x38] sm:$0xff] }
   0x4   :  { %v40_v10 = vpack.c.bf16 %v26_v9, %v25_v7  ;;  %v29_v13 = vld [vmem:[%s591_s0 + $0x40] sm:$0xff]  ;;  %v30_v14 = vld [vmem:[%s591_s0 + $0x48] sm:$0xff]  ;;  %v41_v15 = vpack.c.bf16 %v28_v12, %v27_v11  ;;  %v31_v17 = vld [vmem:[%s591_s0 + $0x50] sm:$0xff] }
   0x5   :  { %384 = vmatprep.mubr.msk.bf16.mxu0 %vm53_vm1, %v38_v4  ;;  %v42_v16 = vpack.c.bf16 %v30_v14, %v29_v13  ;;  %v32_v18 = vld [vmem:[%s591_s0 + $0x58] sm:$0xff]  ;;  %v33_v19 = vld [vmem:[%s591_s0 + $0x60] sm:$0xff]  ;;  %v34_v20 = vld [vmem:[%s591_s0 + $0x68] sm:$0xff] }
   0x6   :  { %385 = vmatmul.mubr.msk.bf16.vlgmr.msra.gmra.mxu0 %vm53_vm1, %v39_v8  ;;  %v43_v21 = vpack.c.bf16 %v32_v18, %v31_v17  ;;  %v44_v22 = vpack.c.bf16 %v34_v20, %v33_v19  ;;  %v35_v23 = vld [vmem:[%s591_s0 + $0x70] sm:$0xff]  ;;  %v36_v24 = vld [vmem:[%s591_s0 + $0x78] sm:$0xff]  ;;  %v419_v26 = vld [vmem:[%s592_s3] sm:$0xff]  }
   0x7   :  { %388 = vmatprep.mubr.msk.bf16.mxu0 %vm53_vm1, %v40_v10  ;;  %v45_v25 = vpack.c.bf16 %v36_v24, %v35_v23  ;;  %400 = vmatprep.subr.bf16.mxu1 %v419_v26  ;;  %v345_v30 = vld [vmem:[%s593_s2] ss:$0 sm:$0xff] }
   0x8   :  { %401 = vmatpush3.bf16.msra.mxu1 %v419_v26  ;;  %v354_v4 = vld [vmem:[%s594_s4] ss:$0 sm:$0xff] }
   0xe   :  { %389 = vmatmul.mubr.msk.bf16.gmra.mxu0 %vm53_vm1, %v41_v15 }
   0xf   :  { %392 = vmatprep.mubr.msk.bf16.mxu0 %vm53_vm1, %v42_v16 }
  0x16   :  { %393 = vmatmul.mubr.msk.bf16.gmra.mxu0 %vm53_vm1, %v43_v21 }
  0x17   :  { %396 = vmatprep.mubr.msk.bf16.mxu0 %vm53_vm1, %v44_v22 }
  0x1e   :  { %397 = vmatmul.mubr.msk.bf16.gmra.mxu0 %vm53_vm1, %v45_v25 }
  0xc6   :  { %v386_v27 = vpop.f32.mrf.mxu0 }
  0xc7   :  { %v125_v35 = vadd.f32 %v386_v27, %v345_v30 }
  0xc8   :  { %v116_v28 = vpop.f32.mrf.mxu0 }
  0xc9   :  { %v117_v33 = vadd.f32 %v345_v30, %v116_v28 }
  0xca   :  { %v387_v29 = vpop.f32.mrf.mxu0 }
  0xcb   :  { %v128_v31 = vadd.f32 %v387_v29, %v345_v30 }
  0xcc   :  { %v119_v32 = vpop.f32.mrf.mxu0 }
  0xcd   :  { %v120_v34 = vadd.f32 %v345_v30, %v119_v32  ;;  %v182_v38 = vpack.c.bf16 %v128_v31, %v125_v35 }
  0xce   :  { %v390_v36 = vpop.f32.mrf.mxu0 }
  0xcf   :  { %v181_v37 = vpack.c.bf16 %v120_v34, %v117_v33  ;;  %v141_v45 = vadd.f32 %v390_v36, %v345_v30 }
  0xd0   :  { %v132_v39 = vpop.f32.mrf.mxu0 }
  0xd1   :  { %402 = vmatprep.mubr.msk.bf16.mxu1 %vm202_vm2, %v181_v37  ;;  %v133_v43 = vadd.f32 %v345_v30, %v132_v39 }
  0xd2   :  { %v391_v40 = vpop.f32.mrf.mxu0  ;;  %403 = vmatmul.mubr.msk.bf16.vlgmr.msra.gmra.mxu1 %vm202_vm2, %v182_v38 }
  0xd3   :  { %v144_v41 = vadd.f32 %v391_v40, %v345_v30 }
  0xd4   :  { %v135_v42 = vpop.f32.mrf.mxu0 }
  0xd5   :  { %v136_v44 = vadd.f32 %v345_v30, %v135_v42  ;;  %v184_v48 = vpack.c.bf16 %v144_v41, %v141_v45 }
  0xd6   :  { %v394_v46 = vpop.f32.mrf.mxu0 }
  0xd7   :  { %v183_v47 = vpack.c.bf16 %v136_v44, %v133_v43  ;;  %v157_v55 = vadd.f32 %v394_v46, %v345_v30 }
  0xd8   :  { %v148_v49 = vpop.f32.mrf.mxu0 }
  0xd9   :  { %406 = vmatprep.mubr.msk.bf16.mxu1 %vm202_vm2, %v183_v47  ;;  %v149_v53 = vadd.f32 %v345_v30, %v148_v49 }
  0xda   :  { %v395_v50 = vpop.f32.mrf.mxu0  ;;  %407 = vmatmul.mubr.msk.bf16.gmra.mxu1 %vm202_vm2, %v184_v48 }
  0xdb   :  { %v160_v51 = vadd.f32 %v395_v50, %v345_v30 }
  0xdc   :  { %v151_v52 = vpop.f32.mrf.mxu0 }
  0xdd   :  { %v152_v54 = vadd.f32 %v345_v30, %v151_v52  ;;  %v186_v58 = vpack.c.bf16 %v160_v51, %v157_v55 }
  0xde   :  { %v398_v56 = vpop.f32.mrf.mxu0 }
  0xdf   :  { %v185_v57 = vpack.c.bf16 %v152_v54, %v149_v53  ;;  %v173_v1 = vadd.f32 %v398_v56, %v345_v30 }
  0xe0   :  { %v164_v59 = vpop.f32.mrf.mxu0 }
  0xe1   :  { %410 = vmatprep.mubr.msk.bf16.mxu1 %vm202_vm2, %v185_v57  ;;  %v165_v63 = vadd.f32 %v345_v30, %v164_v59 }
  0xe2   :  { %v399_v60 = vpop.f32.mrf.mxu0  ;;  %411 = vmatmul.mubr.msk.bf16.gmra.mxu1 %vm202_vm2, %v186_v58 }
  0xe3   :  { %v176_v61 = vadd.f32 %v399_v60, %v345_v30 }
  0xe4   :  { %v167_v62 = vpop.f32.mrf.mxu0 }
  0xe5   :  { %v168_v0 = vadd.f32 %v345_v30, %v167_v62  ;;  %v188_v3 = vpack.c.bf16 %v176_v61, %v173_v1 }
  0xe7   :  { %v187_v2 = vpack.c.bf16 %v168_v0, %v165_v63 }
  0xe9   :  { %414 = vmatprep.mubr.msk.bf16.mxu1 %vm202_vm2, %v187_v2 }
  0xea   :  { %415 = vmatmul.mubr.msk.bf16.gmra.mxu1 %vm202_vm2, %v188_v3 }
 0x192   :  { %v404_v5 = vpop.f32.mrf.mxu1 }
 0x193   :  { %v270_v6 = vadd.f32 %v404_v5, %v354_v4 }
 0x194   :  { %v261_v7 = vpop.f32.mrf.mxu1 }
 0x195   :  { %327 = vst.msk [vmem:[%s595_s5 + $0x10] sm:$0xff] %vm324_vm3, %v270_v6  ;;  %v262_v8 = vadd.f32 %v354_v4, %v261_v7 }
 0x196   :  { %v405_v9 = vpop.f32.mrf.mxu1 }
 0x197   :  { %325 = vst.msk [vmem:[%s595_s5] sm:$0xff] %vm324_vm3, %v262_v8  ;;  %v273_v10 = vadd.f32 %v405_v9, %v354_v4 }
 0x198   :  { %v264_v11 = vpop.f32.mrf.mxu1 }
 0x199   :  { %328 = vst.msk [vmem:[%s595_s5 + $0x18] sm:$0xff] %vm324_vm3, %v273_v10  ;;  %v265_v12 = vadd.f32 %v354_v4, %v264_v11 }
 0x19a   :  { %v408_v13 = vpop.f32.mrf.mxu1 }
 0x19b   :  { %326 = vst.msk [vmem:[%s595_s5 + $0x8] sm:$0xff] %vm324_vm3, %v265_v12  ;;  %v286_v14 = vadd.f32 %v408_v13, %v354_v4 }
 0x19c   :  { %v277_v15 = vpop.f32.mrf.mxu1 }
 0x19d   :  { %331 = vst.msk [vmem:[%s595_s5 + $0x30] sm:$0xff] %vm324_vm3, %v286_v14  ;;  %v278_v16 = vadd.f32 %v354_v4, %v277_v15 }
 0x19e   :  { %v409_v17 = vpop.f32.mrf.mxu1 }
 0x19f   :  { %329 = vst.msk [vmem:[%s595_s5 + $0x20] sm:$0xff] %vm324_vm3, %v278_v16  ;;  %v289_v18 = vadd.f32 %v409_v17, %v354_v4 }
 0x1a0   :  { %v280_v19 = vpop.f32.mrf.mxu1 }
 0x1a1   :  { %332 = vst.msk [vmem:[%s595_s5 + $0x38] sm:$0xff] %vm324_vm3, %v289_v18  ;;  %v281_v20 = vadd.f32 %v354_v4, %v280_v19 }
 0x1a2   :  { %v412_v21 = vpop.f32.mrf.mxu1 }
 0x1a3   :  { %330 = vst.msk [vmem:[%s595_s5 + $0x28] sm:$0xff] %vm324_vm3, %v281_v20  ;;  %v302_v22 = vadd.f32 %v412_v21, %v354_v4 }
 0x1a4   :  { %v293_v23 = vpop.f32.mrf.mxu1 }
 0x1a5   :  { %335 = vst.msk [vmem:[%s595_s5 + $0x50] sm:$0xff] %vm324_vm3, %v302_v22  ;;  %v294_v24 = vadd.f32 %v354_v4, %v293_v23 }
 0x1a6   :  { %v413_v25 = vpop.f32.mrf.mxu1 }
 0x1a7   :  { %333 = vst.msk [vmem:[%s595_s5 + $0x40] sm:$0xff] %vm324_vm3, %v294_v24  ;;  %v305_v26 = vadd.f32 %v413_v25, %v354_v4 }
 0x1a8   :  { %v296_v27 = vpop.f32.mrf.mxu1 }
 0x1a9   :  { %336 = vst.msk [vmem:[%s595_s5 + $0x58] sm:$0xff] %vm324_vm3, %v305_v26  ;;  %v297_v28 = vadd.f32 %v354_v4, %v296_v27 }
 0x1aa   :  { %v416_v29 = vpop.f32.mrf.mxu1 }
 0x1ab   :  { %334 = vst.msk [vmem:[%s595_s5 + $0x48] sm:$0xff] %vm324_vm3, %v297_v28  ;;  %v318_v30 = vadd.f32 %v416_v29, %v354_v4 }
 0x1ac   :  { %v309_v31 = vpop.f32.mrf.mxu1 }
 0x1ad   :  { %339 = vst.msk [vmem:[%s595_s5 + $0x70] sm:$0xff] %vm324_vm3, %v318_v30  ;;  %v310_v32 = vadd.f32 %v354_v4, %v309_v31 }
 0x1ae   :  { %v417_v33 = vpop.f32.mrf.mxu1 }
 0x1af   :  { %337 = vst.msk [vmem:[%s595_s5 + $0x60] sm:$0xff] %vm324_vm3, %v310_v32  ;;  %v321_v34 = vadd.f32 %v417_v33, %v354_v4 }
 0x1b0   :  { %v312_v35 = vpop.f32.mrf.mxu1 }
 0x1b1   :  { %340 = vst.msk [vmem:[%s595_s5 + $0x78] sm:$0xff] %vm324_vm3, %v321_v34  ;;  %v313_v36 = vadd.f32 %v354_v4, %v312_v35 }
 0x1b3   :  { %338 = vst.msk [vmem:[%s595_s5 + $0x68] sm:$0xff] %vm324_vm3, %v313_v36 }

</bundles_post_ra>
